<compile_context>
chip_gen: v7x
topology: tpu7x:2x2x1
jax: 0.10.0
libtpu: 0.0.40
codegen_flags: <defaults>
</compile_context>

<pallas_src>
import math
import functools

import numpy as np
import jax
import jax.numpy as jnp
from jax.experimental import pallas as pl
from jax.experimental.pallas import tpu as pltpu

_LANES = 128
_SUBLANES = 8
_MAX_ROW_TILE = 1024
# Budget for the double-buffered x/out tiles (2 arrays x 2 buffers x tile x L x 4B).
# Kept comfortably inside the default scoped VMEM limit on every generation
# (16 MiB v5e, 32 MiB v6e/v7x; v7x only has 64 MiB physical VMEM per TensorCore).
_VMEM_TILE_BUDGET_BYTES = 8 * 1024 * 1024
_MAX_PACK = 16  # don't lane-pack more than 16 rows per 128-lane row


def _round_up(a, b):
    return (a + b - 1) // b * b


def _pos_enc_kernel(x_ref, t_ref, divmask_ref, phase_ref, o_ref, *, k):
    # x_ref/o_ref: (tile, L); t_ref: (tile, k); divmask_ref: (k, L); phase_ref: (1, L)
    t = t_ref[...]
    dm = divmask_ref[...]
    # Exact lane-broadcast of each packed timestep onto its d_model lane group:
    # divmask row g holds div_term on group g's lanes and 0 elsewhere.
    angle = t[:, 0:1] * dm[0:1, :]
    for g in range(1, k):
        angle = angle + t[:, g:g + 1] * dm[g:g + 1, :]
    angle = angle + phase_ref[...]
    pe = jnp.sin(angle)  # cos folded in via +pi/2 phase on odd lanes
    o_ref[...] = (x_ref[...].astype(jnp.float32) + pe).astype(o_ref.dtype)


def positional_encoding(x, t, *, max_row_tile=_MAX_ROW_TILE):
    """x: (B, S, d_model), t: (B, S) -> x + sinusoidal_pe(t), shape (B, S, d_model)."""
    B, S, d_model = x.shape
    assert t.shape == (B, S)
    assert d_model % 2 == 0, "d_model must be even (sin/cos interleave)"
    rows = B * S

    # Lane-pack small feature dims so the output's last dim is 128-lane dense.
    if d_model < _LANES and _LANES % d_model == 0 and (_LANES // d_model) <= _MAX_PACK:
        k = _LANES // d_model
    else:
        k = 1
    lane_width = k * d_model

    # Row tile: multiple of 8, capped by the VMEM budget and the (padded) problem size.
    p0 = pl.cdiv(rows, k)  # packed row count (unpadded)
    vmem_cap = max(_SUBLANES, _VMEM_TILE_BUDGET_BYTES // (16 * lane_width))
    tile = min(max_row_tile, vmem_cap, _round_up(p0, _SUBLANES))
    tile = max(_SUBLANES, (tile // _SUBLANES) * _SUBLANES)
    p = _round_up(p0, tile)      # padded packed row count
    padded_rows = p * k

    x2 = x.reshape(rows, d_model)
    t1 = t.reshape(rows).astype(jnp.float32)
    if padded_rows != rows:
        x2 = jnp.pad(x2, ((0, padded_rows - rows), (0, 0)))
        t1 = jnp.pad(t1, (0, padded_rows - rows))
    xp = x2.reshape(p, lane_width)
    tp = t1.reshape(p, k)

    # Host-side constants, resident in VMEM across all grid steps (block index fixed).
    lane = np.arange(lane_width)
    m = lane % d_model
    c = -math.log(10000.0) / d_model
    div_full = np.exp((m // 2 * 2).astype(np.float64) * c).astype(np.float32)
    phase = np.where(m % 2 == 0, 0.0, 0.5 * math.pi).astype(np.float32)
    divmask = np.zeros((k, lane_width), np.float32)
    divmask[lane // d_model, lane] = div_full
    divmask = jnp.asarray(divmask)
    phase = jnp.asarray(phase.reshape(1, lane_width))

    grid = (p // tile,)
    cost = pl.CostEstimate(
        flops=int((2 * k + 2) * p * lane_width),
        transcendentals=int(p * lane_width),
        bytes_accessed=int((2 * p * lane_width + p * k) * 4),
    )

    out = pl.pallas_call(
        functools.partial(_pos_enc_kernel, k=k),
        out_shape=jax.ShapeDtypeStruct((p, lane_width), x.dtype),
        grid_spec=pltpu.PrefetchScalarGridSpec(
            num_scalar_prefetch=0,
            grid=grid,
            in_specs=[
                pl.BlockSpec((tile, lane_width), lambda i: (i, 0)),
                pl.BlockSpec((tile, k), lambda i: (i, 0)),
                pl.BlockSpec((k, lane_width), lambda i: (0, 0)),
                pl.BlockSpec((1, lane_width), lambda i: (0, 0)),
            ],
            out_specs=pl.BlockSpec((tile, lane_width), lambda i: (i, 0)),
        ),
        compiler_params=pltpu.CompilerParams(
            dimension_semantics=("parallel",),
        ),
        cost_estimate=cost,
    )(xp, tp, divmask, phase)

    out = out.reshape(padded_rows, d_model)
    if padded_rows != rows:
        out = out[:rows]
    return out.reshape(B, S, d_model)


def _reference(x, t, d_model):
    # Pure-JAX reference mirroring the PyTorch forward (eval mode).
    div_term = jnp.exp(
        jnp.arange(0, d_model, 2, dtype=jnp.float32) * (-math.log(10000.0) / d_model)
    )
    ang = t[..., None] * div_term
    pe = jnp.zeros((*t.shape, d_model), dtype=jnp.float32)
    pe = pe.at[..., 0::2].set(jnp.sin(ang))
    pe = pe.at[..., 1::2].set(jnp.cos(ang))
    return x + pe


if __name__ == "__main__":
    key = jax.random.PRNGKey(0)

    # Case 1: small d_model (< 128) -> lane-packed path (k = 128 // d_model = 4).
    B, S, d_model = 2, 8, 32
    k1, k2, key = jax.random.split(key, 3)
    x = jax.random.normal(k1, (B, S, d_model), dtype=jnp.float32)
    t = jax.random.uniform(k2, (B, S), dtype=jnp.float32, minval=0.0, maxval=100.0)
    out = jax.block_until_ready(positional_encoding(x, t))
    ref = _reference(x, t, d_model)
    assert out.shape == (B, S, d_model)
    assert jnp.allclose(out, ref, atol=1e-4, rtol=1e-4), "mismatch vs reference (packed path)"

    # Case 2: lane-dense d_model (= 128) with a row count that needs padding.
    B, S, d_model = 3, 5, 128
    k1, k2, key = jax.random.split(key, 3)
    x = jax.random.normal(k1, (B, S, d_model), dtype=jnp.float32)
    t = jax.random.uniform(k2, (B, S), dtype=jnp.float32, minval=0.0, maxval=100.0)
    out = jax.block_until_ready(positional_encoding(x, t))
    ref = _reference(x, t, d_model)
    assert out.shape == (B, S, d_model)
    assert jnp.allclose(out, ref, atol=1e-4, rtol=1e-4), "mismatch vs reference (dense path)"

    print("KERNEL_OK")
</pallas_src>

<mosaic_0001>
module attributes {stable_mosaic.version = 11 : i64} {
  func.func @_pos_enc_kernel(%arg0: i32, %arg1: memref<8x128xf32, #tpu.memory_space<vmem>>, %arg2: memref<8x4xf32, #tpu.memory_space<vmem>>, %arg3: memref<4x128xf32, #tpu.memory_space<vmem>>, %arg4: memref<1x128xf32, #tpu.memory_space<vmem>>, %arg5: memref<8x128xf32, #tpu.memory_space<vmem>>) attributes {dimension_semantics = [#tpu.dimension_semantics<parallel>], iteration_bounds = array<i64: 1>, scalar_prefetch = 0 : i64, scratch_operands = 0 : i64, tpu.core_type = #tpu.core_type<tc>, window_params = [{transform_indices = @transform_0, window_bounds = array<i64: 8, 128>}, {transform_indices = @transform_1, window_bounds = array<i64: 8, 4>}, {pipeline_mode = #tpu.pipeline_mode<synchronous>, transform_indices = @transform_2, window_bounds = array<i64: 4, 128>}, {pipeline_mode = #tpu.pipeline_mode<synchronous>, transform_indices = @transform_3, window_bounds = array<i64: 1, 128>}, {transform_indices = @transform_4, window_bounds = array<i64: 8, 128>}]} {
    %c0 = arith.constant 0 : index
    %c0_0 = arith.constant 0 : index
    %0 = vector.load %arg2[%c0, %c0_0] : memref<8x4xf32, #tpu.memory_space<vmem>>, vector<8x4xf32>
    %c0_1 = arith.constant 0 : index
    %c0_2 = arith.constant 0 : index
    %1 = vector.load %arg3[%c0_1, %c0_2] : memref<4x128xf32, #tpu.memory_space<vmem>>, vector<4x128xf32>
    %2 = vector.extract_strided_slice %0 {offsets = [0, 0], sizes = [8, 1], strides = [1, 1]} : vector<8x4xf32> to vector<8x1xf32>
    %3 = vector.extract_strided_slice %1 {offsets = [0, 0], sizes = [1, 128], strides = [1, 1]} : vector<4x128xf32> to vector<1x128xf32>
    %4 = vector.broadcast %2 : vector<8x1xf32> to vector<8x128xf32>
    %5 = vector.broadcast %3 : vector<1x128xf32> to vector<8x128xf32>
    %6 = arith.mulf %4, %5 : vector<8x128xf32>
    %7 = vector.extract_strided_slice %0 {offsets = [0, 1], sizes = [8, 1], strides = [1, 1]} : vector<8x4xf32> to vector<8x1xf32>
    %8 = vector.extract_strided_slice %1 {offsets = [1, 0], sizes = [1, 128], strides = [1, 1]} : vector<4x128xf32> to vector<1x128xf32>
    %9 = vector.broadcast %7 : vector<8x1xf32> to vector<8x128xf32>
    %10 = vector.broadcast %8 : vector<1x128xf32> to vector<8x128xf32>
    %11 = arith.mulf %9, %10 : vector<8x128xf32>
    %12 = arith.addf %6, %11 : vector<8x128xf32>
    %13 = vector.extract_strided_slice %0 {offsets = [0, 2], sizes = [8, 1], strides = [1, 1]} : vector<8x4xf32> to vector<8x1xf32>
    %14 = vector.extract_strided_slice %1 {offsets = [2, 0], sizes = [1, 128], strides = [1, 1]} : vector<4x128xf32> to vector<1x128xf32>
    %15 = vector.broadcast %13 : vector<8x1xf32> to vector<8x128xf32>
    %16 = vector.broadcast %14 : vector<1x128xf32> to vector<8x128xf32>
    %17 = arith.mulf %15, %16 : vector<8x128xf32>
    %18 = arith.addf %12, %17 : vector<8x128xf32>
    %19 = vector.extract_strided_slice %0 {offsets = [0, 3], sizes = [8, 1], strides = [1, 1]} : vector<8x4xf32> to vector<8x1xf32>
    %20 = vector.extract_strided_slice %1 {offsets = [3, 0], sizes = [1, 128], strides = [1, 1]} : vector<4x128xf32> to vector<1x128xf32>
    %21 = vector.broadcast %19 : vector<8x1xf32> to vector<8x128xf32>
    %22 = vector.broadcast %20 : vector<1x128xf32> to vector<8x128xf32>
    %23 = arith.mulf %21, %22 : vector<8x128xf32>
    %24 = arith.addf %18, %23 : vector<8x128xf32>
    %c0_3 = arith.constant 0 : index
    %c0_4 = arith.constant 0 : index
    %25 = vector.load %arg4[%c0_3, %c0_4] : memref<1x128xf32, #tpu.memory_space<vmem>>, vector<1x128xf32>
    %26 = vector.broadcast %25 : vector<1x128xf32> to vector<8x128xf32>
    %27 = arith.addf %24, %26 : vector<8x128xf32>
    %28 = math.sin %27 : vector<8x128xf32>
    %c0_5 = arith.constant 0 : index
    %c0_6 = arith.constant 0 : index
    %29 = vector.load %arg1[%c0_5, %c0_6] : memref<8x128xf32, #tpu.memory_space<vmem>>, vector<8x128xf32>
    %30 = arith.addf %29, %28 : vector<8x128xf32>
    %c0_7 = arith.constant 0 : index
    %c0_8 = arith.constant 0 : index
    %31 = vector.load %arg5[%c0_7, %c0_8] : memref<8x128xf32, #tpu.memory_space<vmem>>, vector<8x128xf32>
    tpu.vector_store %arg5[%c0_7, %c0_8], %30 {strides = array<i32>} : memref<8x128xf32, #tpu.memory_space<vmem>>, vector<8x128xf32>,
    return
  }
  func.func @transform_0(%arg0: i32) -> (i32, i32) {
    %c0_i32 = arith.constant 0 : i32
    %c0_i32_0 = arith.constant 0 : i32
    return %arg0, %c0_i32 : i32, i32
  }
  func.func @transform_1(%arg0: i32) -> (i32, i32) {
    %c0_i32 = arith.constant 0 : i32
    %c0_i32_0 = arith.constant 0 : i32
    return %arg0, %c0_i32 : i32, i32
  }
  func.func @transform_2(%arg0: i32) -> (i32, i32) {
    %c0_i32 = arith.constant 0 : i32
    %c0_i32_0 = arith.constant 0 : i32
    %c0_i32_1 = arith.constant 0 : i32
    return %c0_i32, %c0_i32_0 : i32, i32
  }
  func.func @transform_3(%arg0: i32) -> (i32, i32) {
    %c0_i32 = arith.constant 0 : i32
    %c0_i32_0 = arith.constant 0 : i32
    %c0_i32_1 = arith.constant 0 : i32
    return %c0_i32, %c0_i32_0 : i32, i32
  }
  func.func @transform_4(%arg0: i32) -> (i32, i32) {
    %c0_i32 = arith.constant 0 : i32
    %c0_i32_0 = arith.constant 0 : i32
    return %arg0, %c0_i32 : i32, i32
  }
}

</mosaic_0001>

<bundles_post_ra>
// kernel: tpu_custom_call.1
= control target key start
LH: loop header
LB: loop body
LE: loop exit
PB: predicated region body
PF: predicated region fallthrough
CT: control target
= control target key end

     0   :  { %v242_v1 = vmov 0   ;;  %v243_v2 = vmov 2   ;;  %s323_s0 = inlined_call_operand.vmem [shape: f32[8,128], index: 0, kind: input, shape index: {}]   ;;  %s324_s1 = inlined_call_operand.vmem [shape: f32[8,4], index: 1, kind: input, shape index: {}]   ;;  %s325_s2 = inlined_call_operand.vmem [shape: f32[4,128], index: 2, kind: input, shape index: {}]   ;;  %s326_s3 = inlined_call_operand.vmem [shape: f32[1,128], index: 3, kind: input, shape index: {}]   ;;  %s327_s4 = inlined_call_operand.hbm [shape: f32[8,128], index: 4, kind: output, shape index: {}]  }
   0x1   :  { %v18_v0 = vld [vmem:[%s324_s1] sm:$0xff]  ;;  %209 = vset.pattern.permute.xlu0 %v242_v1  ;;  %211 = vset.pattern.permute.xlu1 %v243_v2 }
   0x2   :  { %9 = vsyncpa [#allocation3], 0  ;;  %22 = vperm.xlu0 %209, %v18_v0   ;;  %41 = vperm.xlu1 %211, %v18_v0   ;;  %v244_v3 = vmov 1   ;;  %v245_v4 = vmov 3   ;;  %v25_v5 = vlaneseq  ;;  %v19_v9 = vld [vmem:[%s325_s2] sm:$0xf] }
   0x3   :  { %v189_v26 = vld [vmem:[%s326_s3] ss:$0 sm:$0xff]  ;;  %v246_v39 = vmov 683565275   ;;  %v247_v41 = vmov 2475754826  }
   0x4   :  { %v26_v6 = vshrl.u32 %v25_v5, 7  ;;  %v248_v44 = vmov 2131351028   ;;  %v249_v47 = vmov 2102212464   ;;  %s252_s20 = smov [#allocation2]  }
   0x5   :  { %v250_v50 = vmov 920167782   ;;  %v251_v53 = vmov 1326507024   ;;  %s181_s21 = sshll.u32 %s252_s20, 4  ;;  %s182_s21 = int_to_ptr.vmem [resolvable:$true] %s181_s21 }
   0x6   :  { %210 = vset.pattern.permute.xlu0 %v244_v3  ;;  %212 = vset.pattern.permute.xlu1 %v245_v4  ;;  %v27_v7 = vsub.s32 0, %v26_v6  ;;  %v36_v8 = vsub.s32 1, %v26_v6  ;;  %v46_v11 = vsub.s32 2, %v26_v6  ;;  %v56_v13 = vsub.s32 3, %v26_v6  ;;  %s218_s22 = scalar_lea.vmem %s182_s21, 128  ;;  %p223_p1 = scmp.lt.s32.totalorder %s182_s21, %s182_s21 }
   0x7   :  { %31 = vperm.xlu0 %210, %v18_v0   ;;  %51 = vperm.xlu1 %212, %v18_v0   ;;  %p219_p0 = scmp.ne.s32.totalorder %s182_s21, %s218_s22  ;;  %p224_p2 = scmp.lt.s32.totalorder %s218_s22, %s218_s22 }
   0x8   :  { %v28_v14 = vrot.slane %v19_v9, %v27_v7  ;;  %v37_v15 = vrot.slane %v19_v9, %v36_v8  ;;  %v47_v16 = vrot.slane %v19_v9, %v46_v11  ;;  %v57_v17 = vrot.slane %v19_v9, %v56_v13 }
   0x9   :  { %p225_p3 = por %p224_p2, %p223_p1 }
   0xb   :  { %213 = vset.pattern.permute.xlu0 %v245_v4  ;;  %p226_p4 = pnand %p225_p3, %p219_p0 }
  0x81   :  { %v23_v10 = vpop.permute.xlu0 %22  ;;  %v42_v12 = vpop.permute.xlu1 %41 }
  0x82   :  { %v29_v20 = vmul.f32 %v28_v14, %v23_v10  ;;  %v48_v22 = vmul.f32 %v47_v16, %v42_v12 }
  0x86   :  { %v32_v18 = vpop.permute.xlu0 %31  ;;  %v52_v19 = vpop.permute.xlu1 %51 }
  0x87   :  { %v38_v21 = vmul.f32 %v37_v15, %v32_v18  ;;  %v58_v24 = vmul.f32 %v57_v17, %v52_v19 }
  0x89   :  { %v39_v23 = vadd.f32 %v38_v21, %v29_v20 }
  0x8b   :  { %v49_v25 = vadd.f32 %v48_v22, %v39_v23 }
  0x8d   :  { %v59_v27 = vadd.f32 %v58_v24, %v49_v25 }
  0x8f   :  { %v287_v28 = vadd.f32 %v189_v26, %v59_v27 }
  0x91   :  { %v71_v29 = vand.u32 2139095040, %v287_v28  ;;  %v68_v33 = vand.u32 2147483647, %v287_v28  ;;  %vm70_vm7 = vcmp.lt.s32.totalorder %v287_v28, 0  ;;  %vm160_vm12 = vweird.f32 %v287_v28 }
  0x93   :  { %v72_v30 = vshrl.u32 %v71_v29, 23  ;;  %v75_v37 = vand.u32 8388607, %v68_v33  ;;  %vm69_vm8 = vcmp.le.f32.partialorder %v68_v33, 0.7853982  ;;  %v172_v33 = vld [vmem:[%s323_s0] sm:$0xff] }
  0x95   :  { %v190_v31 = vadd.s32 4294967169, %v72_v30  ;;  %v76_v55 = vor.u32 8388608, %v75_v37 }
  0x97   :  { %v78_v32 = vadd.s32 1, %v190_v31  ;;  %v116_v5 = vshll.u32 %v76_v55, 8 }
  0x99   :  { %vm79_vm0 = vcmp.gt.s32.totalorder %v78_v32, 0 }
  0x9a   :  { %v80_v34 = vsel %vm79_vm0, %v78_v32, 0 }
  0x9b   :  { %v82_v35 = vand.u32 31, %v80_v34  ;;  %v81_v38 = vshrl.u32 %v80_v34, 5 }
  0x9d   :  { %v83_v36 = vsub.s32 32, %v82_v35  ;;  %v85_v40 = vshll.u32 %v246_v39, %v82_v35  ;;  %v88_v42 = vshll.u32 %v247_v41, %v82_v35  ;;  %v91_v46 = vshll.u32 %v248_v44, %v82_v35 }
  0x9e   :  { %v94_v49 = vshll.u32 %v249_v47, %v82_v35  ;;  %v97_v52 = vshll.u32 %v250_v50, %v82_v35  ;;  %vm100_vm1 = vcmp.lt.s32.totalorder %v81_v38, 1  ;;  %vm103_vm2 = vcmp.lt.s32.totalorder %v81_v38, 4 }
  0x9f   :  { %v86_v43 = vshrl.u32 %v247_v41, %v83_v36  ;;  %v89_v45 = vshrl.u32 %v248_v44, %v83_v36  ;;  %v92_v48 = vshrl.u32 %v249_v47, %v83_v36  ;;  %v95_v51 = vshrl.u32 %v250_v50, %v83_v36 }
  0xa0   :  { %v98_v54 = vshrl.u32 %v251_v53, %v83_v36  ;;  %v84_v0 = vshrl.u32 %v246_v39, %v83_v36  ;;  %vm102_vm3 = vcmp.lt.s32.totalorder %v81_v38, 3  ;;  %vm101_vm4 = vcmp.lt.s32.totalorder %v81_v38, 2 }
  0xa1   :  { %v87_v56 = vor.u32 %v86_v43, %v85_v40  ;;  %v90_v57 = vor.u32 %v89_v45, %v88_v42  ;;  %v93_v58 = vor.u32 %v92_v48, %v91_v46  ;;  %v96_v59 = vor.u32 %v95_v51, %v94_v49 }
  0xa2   :  { %v99_v60 = vor.u32 %v98_v54, %v97_v52 }
  0xa3   :  { %v105_v61 = vsel %vm103_vm2, %v93_v58, 2102212464  ;;  %v108_v62 = vsel %vm100_vm1, %v87_v56, %v90_v57  ;;  %v112_v63 = vsel %vm100_vm1, %v90_v57, %v93_v58  ;;  %v109_v1 = vsel %vm103_vm2, %v96_v59, 920167782 }
  0xa4   :  { %v113_v2 = vsel %vm103_vm2, %v99_v60, 1326507024  ;;  %v110_v3 = vsel %vm102_vm3, %v93_v58, %v109_v1  ;;  %v104_v6 = vsel %vm100_vm1, %v84_v0, %v87_v56  ;;  %v106_v7 = vsel %vm102_vm3, %v90_v57, %v105_v61 }
  0xa5   :  { %v114_v4 = vsel %vm102_vm3, %v96_v59, %v113_v2  ;;  %v111_v8 = vsel %vm101_vm4, %v108_v62, %v110_v3  ;;  %v107_v14 = vsel %vm101_vm4, %v104_v6, %v106_v7 }
  0xa6   :  { %v115_v9 = vsel %vm101_vm4, %v112_v63, %v114_v4  ;;  %v296_v12 = vmul.u32.u64.low %v116_v5, %v111_v8  ;;  %v297_v13 = vmul.u32.u64.high %v116_v5, %v111_v8, %v296_v12  ;;  %v123_v16 = vmul.u32 %v116_v5, %v107_v14 }
  0xa7   :  { %v293_v10 = vmul.u32.u64.low %v116_v5, %v115_v9  ;;  %v294_v11 = vmul.u32.u64.high %v116_v5, %v115_v9, %v293_v10 }
  0xa8   :  { %v126_v15 = vadd.s32 1, %v297_v13 }
  0xa9   :  { %vm125_vm5 = vc.u32 %v294_v11, %v296_v12  ;;  %v124_v29 = vadd.s32 %v296_v12, %v294_v11 }
  0xaa   :  { %v127_v17 = vsel %vm125_vm5, %v126_v15, %v297_v13 }
  0xab   :  { %v128_v18 = vadd.s32 %v127_v17, %v123_v16 }
  0xad   :  { %v129_v19 = vadd.s32 536870912, %v128_v18 }
  0xaf   :  { %v130_v20 = vshrl.u32 %v129_v19, 30 }
  0xb1   :  { %v131_v21 = vshll.u32 %v130_v20, 30  ;;  %v154_v42 = vsub.s32 4, %v130_v20 }
  0xb3   :  { %v132_v22 = vsub.s32 %v128_v18, %v131_v21  ;;  %v155_v45 = vsel %vm70_vm7, %v154_v42, %v130_v20 }
  0xb4   :  { %v157_v47 = vsel %vm69_vm8, 0, %v155_v45 }
  0xb5   :  { %v134_v23 = vsub.s32 0, %v132_v22  ;;  %v161_v48 = vadd.s32 3, %v157_v47 }
  0xb7   :  { %v191_v24 = vmin.u32 %v134_v23, %v132_v22  ;;  %v162_v49 = vand.u32 3, %v161_v48 }
  0xb9   :  { %v136_v25 = vclz %v191_v24  ;;  %vm167_vm9 = vcmp.eq.s32.totalorder %v162_v49, 2  ;;  %vm164_vm10 = vcmp.eq.s32.totalorder %v162_v49, 0  ;;  %vm163_vm11 = vcmp.lt.s32.totalorder %v162_v49, 2 }
  0xbb   :  { %v192_v26 = vadd.s32 4294967294, %v136_v25 }
  0xbd   :  { %vm193_vm6 = vcmp.lt.s32.totalorder %v192_v26, 0 }
  0xbe   :  { %v139_v27 = vsel %vm193_vm6, 0, %v192_v26 }
  0xbf   :  { %v140_v30 = vsub.s32 32, %v139_v27  ;;  %v144_v31 = vsub.s32 4294967266, %v139_v27  ;;  %v141_v32 = vshll.u32 %v132_v22, %v139_v27 }
  0xc1   :  { %v142_v34 = vshrl.u32 %v124_v29, %v140_v30  ;;  %v145_v35 = vadd.s32 127, %v144_v31 }
  0xc3   :  { %v143_v36 = vor.u32 %v142_v34, %v141_v32  ;;  %v146_v37 = vshll.u32 %v145_v35, 23 }
  0xc5   :  { %v147_v38 = vor.u32 4788187, %v146_v37  ;;  %v150_v40 = vcvt.s32.f32 %v143_v36 }
  0xc7   :  { %v148_v39 = vand.u32 2147483647, %v147_v38 }
  0xc9   :  { %v151_v41 = vmul.f32 %v150_v40, %v148_v39 }
  0xcb   :  { %v152_v43 = vxor.u32 2147483648, %v151_v41 }
  0xcd   :  { %v153_v44 = vsel %vm70_vm7, %v152_v43, %v151_v41 }
  0xce   :  { %v156_v46 = vsel %vm69_vm8, %v287_v28, %v153_v44 }
  0xcf   :  { %214 = vcosq.f32 %v156_v46 }
  0xd0   :  { %216 = vsinq.f32 %v156_v46 }
  0xd9   :  { %v215_v50 = vpop.eup %214 }
  0xda   :  { %v217_v51 = vpop.eup %216  ;;  %v168_v52 = vxor.u32 2147483648, %v215_v50 }
  0xdb   :  { %v165_v53 = vxor.u32 2147483648, %v217_v51 }
  0xdc   :  { %v169_v54 = vsel %vm167_vm9, %v168_v52, %v217_v51 }
  0xdd   :  { %v166_v55 = vsel %vm164_vm10, %v215_v50, %v165_v53 }
  0xde   :  { %v170_v56 = vsel %vm163_vm11, %v166_v55, %v169_v54 }
  0xdf   :  { %v171_v57 = vsel %vm160_vm12, nan, %v170_v56 }
  0xe0   :  { %v173_v58 = vadd.f32 %v172_v33, %v171_v57 }
  0xe2   :  { %174 = vst [vmem:[#allocation2] sm:$0xff] %v173_v58 }
  0xe3   :  { %229 = shalt.err (!%p226_p4)
}
  0xe4   :  { %s230_s0 = scalar_lea.hbm %s327_s4, 128 }
  0xe5   :  { %p231_p5 = scmp.ne.s32.totalorder %s327_s4, %s230_s0  ;;  %p234_p6 = scmp.lt.u32.totalorder %s230_s0, %s327_s4 }
  0xe7   :  { %p236_p7 = pnand %p234_p6, %p231_p5 }
  0xe9   :  { %239 = shalt.err (!%p236_p7)
}
  0xea   :  { %184 = dma.vmem_to_hbm [thread:$0]  %s182_s21, 128, %s327_s4, [#allocation3]  }
  0xeb   :  { %240 = dma.done.wait [#allocation3], 128  }
  0xec   :  { %241 = vsyncadd [#allocation3], 4294967168 }
  0xed   :  { %188 = vsyncpa [#allocation3], 1 }

</bundles_post_ra>
